<compile_context>
chip_gen: v6e
topology: v6e:2x2x1
jax: 0.10.0
libtpu: 0.0.40
codegen_flags: <defaults>
</compile_context>

<pallas_src>
import functools

import jax
import jax.numpy as jnp
from jax.experimental import pallas as pl
from jax.experimental.pallas import tpu as pltpu


def _round_up(x, m):
    return ((x + m - 1) // m) * m


def _vmem_capacity_bytes():
    """Physical VMEM capacity for the current generation (fallback: v7x 64 MiB)."""
    try:
        return int(pltpu.get_tpu_info().vmem_capacity_bytes)
    except Exception:
        return 64 << 20


def _choose_tiles(out_dim, in_dim, itemsize, budget, small_bytes):
    """Pick (tm, tn); prefer full-row tiles (tn = in_dim) that fit the budget."""

    def fits(tm, tn):
        # 2x double-buffered W-in tile + 2x double-buffered out tile + residents.
        return 4 * tm * tn * itemsize + small_bytes <= budget

    # Preferred path: full-row tiles -> contiguous HBM slabs, no inner grid axis.
    tn = in_dim
    row_candidates = (1024, 512, 256, 128, 64, 32, 16, 8)
    fitting = []
    for c in row_candidates:
        tm_c = min(c, out_dim)
        if fits(tm_c, tn) and tm_c not in fitting:
            fitting.append(tm_c)
    if fitting:
        best = fitting[0]
        # Prefer a tm that divides out_dim (no masked edge tile), but never at
        # more than a 2x size penalty versus the largest fitting tile.
        for tm in fitting:
            if tm * 2 < best:
                break
            if out_dim % tm == 0:
                return tm, tn
        return best, tn

    # Fallback for extremely wide in_dim: tile the lane axis too (multiples of 128).
    tm = min(256, out_dim)
    for tn_c in (8192, 4096, 2048, 1024, 512, 256, 128):
        tn_c = min(tn_c, in_dim)
        if fits(tm, tn_c):
            return tm, tn_c
    return min(8, out_dim), min(128, in_dim)


def _lora_merge_kernel(tm, w_ref, b_ref, a_ref, o_ref):
    """One (tm, tn) output tile of: out = W + (lora_A @ lora_B).T * scale.

    w_ref : (tm, tn)           original-weight tile (streamed)
    b_ref : (out_dim_pad, rk)  scale * lora_B^T, fully VMEM-resident (f32)
    a_ref : (rk, tn)           lora_A^T column block (f32); constant block when
                               tn == in_dim, i.e. effectively resident
    """
    row0 = pl.multiple_of(pl.program_id(0) * tm, tm)
    b_tile = b_ref[pl.ds(row0, tm), :]                      # (tm, rk) f32, scale folded
    delta_t = jnp.dot(b_tile, a_ref[...],
                      preferred_element_type=jnp.float32)   # (tm, tn) f32
    o_ref[...] = (w_ref[...].astype(jnp.float32) + delta_t).astype(o_ref.dtype)


def lora_forward(original_weight, lora_A, lora_B, *, alpha=1.1, rank=5,
                 active=True, merge_in_place=False):
    """original_weight: (out_dim, in_dim); lora_A: (in_dim, rank); lora_B: (rank, out_dim)."""
    if not active:
        return original_weight

    scale = float(alpha) / float(rank)
    out_dim, in_dim = original_weight.shape
    itemsize = jnp.dtype(original_weight.dtype).itemsize

    # Tiny LoRA operands stay f32 regardless of the weight dtype (they are a
    # rounding error in VMEM and this sidesteps sub-minimum sublane packing for
    # bf16 / int8 weights).  Rank padded to a sublane multiple with zeros.
    rank_p = _round_up(max(rank, 1), 8)

    # Generation-aware VMEM budget (v5e/v6e: 128 MiB, v7x: 64 MiB per TC).
    vmem_cap = _vmem_capacity_bytes()
    budget = min(int(vmem_cap * 0.70), 100 << 20)
    small_bytes = 2 * 4 * rank_p * (in_dim + out_dim) + (1 << 20)  # residents + margin
    tm, tn = _choose_tiles(out_dim, in_dim, itemsize, budget, small_bytes)

    grid = (pl.cdiv(out_dim, tm), pl.cdiv(in_dim, tn))  # lane (in_dim) axis innermost
    out_dim_pad = grid[0] * tm

    # scale * B^T, padded so the in-kernel dynamic row slice never runs OOB.
    b_s = jnp.transpose(lora_B.astype(jnp.float32)) * jnp.float32(scale)   # (out_dim, rank)
    b_s = jnp.pad(b_s, ((0, out_dim_pad - out_dim), (0, rank_p - rank)))   # (out_dim_pad, rank_p)
    a_t = jnp.pad(jnp.transpose(lora_A.astype(jnp.float32)),
                  ((0, rank_p - rank), (0, 0)))                            # (rank_p, in_dim)

    # VMEM need: double-buffered W-in + out tiles plus the resident LoRA factors.
    tile_bytes = tm * tn * itemsize
    vmem_need = 4 * tile_bytes + 2 * 4 * rank_p * (out_dim_pad + in_dim)
    vmem_limit = int(min(max(vmem_need * 5 // 4, 32 << 20), int(vmem_cap * 0.80)))

    cost = pl.CostEstimate(
        flops=2 * out_dim * in_dim * rank_p + out_dim * in_dim,
        transcendentals=0,
        bytes_accessed=2 * out_dim * in_dim * itemsize
        + 4 * rank_p * (in_dim + out_dim_pad),
    )

    kernel = functools.partial(_lora_merge_kernel, tm)

    return pl.pallas_call(
        kernel,
        out_shape=jax.ShapeDtypeStruct((out_dim, in_dim), original_weight.dtype),
        grid_spec=pltpu.PrefetchScalarGridSpec(
            num_scalar_prefetch=0,
            grid=grid,
            in_specs=[
                pl.BlockSpec((tm, tn), lambda i, j: (i, j)),               # W tile stream
                pl.BlockSpec((out_dim_pad, rank_p), lambda i, j: (0, 0)),  # scale*B^T resident
                pl.BlockSpec((rank_p, tn), lambda i, j: (0, j)),           # A^T col block (constant when tn == in_dim)
            ],
            out_specs=pl.BlockSpec((tm, tn), lambda i, j: (i, j)),
        ),
        compiler_params=pltpu.CompilerParams(
            dimension_semantics=("parallel", "parallel"),
            vmem_limit_bytes=vmem_limit,
        ),
        cost_estimate=cost,
        input_output_aliases={0: 0} if merge_in_place else {},
    )(original_weight, b_s, a_t)


if __name__ == "__main__":
    # Small shapes consistent with the module: in_dim=32, out_dim=64, rank=5.
    in_dim, out_dim, rank, alpha = 32, 64, 5, 1.1
    scale = alpha / rank

    key = jax.random.PRNGKey(0)
    k_w, k_a = jax.random.split(key)

    # Mirror the module's __init__: kaiming_normal_(fan_out) on A, zeros on B.
    lora_A = jax.random.normal(k_a, (in_dim, rank), dtype=jnp.float32) / jnp.sqrt(
        jnp.float32(in_dim)
    )
    lora_B = jnp.zeros((rank, out_dim), dtype=jnp.float32)
    original_weight = jax.random.normal(k_w, (out_dim, in_dim), dtype=jnp.float32)

    out = jax.block_until_ready(
        lora_forward(original_weight, lora_A, lora_B, alpha=alpha, rank=rank)
    )
    ref = original_weight + (lora_A @ lora_B).T * scale
    assert out.shape == (out_dim, in_dim)
    assert jnp.allclose(out, ref, atol=1e-5, rtol=1e-5)

    # Non-zero lora_B to actually exercise the delta path.
    k_b = jax.random.fold_in(key, 2)
    lora_B2 = jax.random.normal(k_b, (rank, out_dim), dtype=jnp.float32) * 0.02
    out2 = jax.block_until_ready(
        lora_forward(original_weight, lora_A, lora_B2, alpha=alpha, rank=rank)
    )
    ref2 = original_weight + (lora_A @ lora_B2).T * scale
    assert jnp.allclose(out2, ref2, atol=1e-5, rtol=1e-5)

    # Larger multi-row-block case: exercises full-row tiling with a multi-step grid.
    k1, k2, k3 = jax.random.split(jax.random.PRNGKey(1), 3)
    big_out, big_in = 4096, 2048
    w_big = jax.random.normal(k1, (big_out, big_in), dtype=jnp.float32)
    a_big = jax.random.normal(k2, (big_in, rank), dtype=jnp.float32) / jnp.sqrt(
        jnp.float32(big_in)
    )
    b_big = jax.random.normal(k3, (rank, big_out), dtype=jnp.float32) * 0.02
    out_big = jax.block_until_ready(
        lora_forward(w_big, a_big, b_big, alpha=alpha, rank=rank)
    )
    ref_big = w_big + (a_big @ b_big).T * scale
    assert jnp.allclose(out_big, ref_big, atol=1e-4, rtol=1e-4)

    # bf16 weight path: LoRA factors stay f32, compute in f32, single final cast.
    k4, k5, k6 = jax.random.split(jax.random.PRNGKey(2), 3)
    bo, bi = 512, 1024
    w_bf = jax.random.normal(k4, (bo, bi), dtype=jnp.float32).astype(jnp.bfloat16)
    a_bf = jax.random.normal(k5, (bi, rank), dtype=jnp.float32) / jnp.sqrt(
        jnp.float32(bi)
    )
    b_bf = jax.random.normal(k6, (rank, bo), dtype=jnp.float32) * 0.02
    out_bf = jax.block_until_ready(
        lora_forward(w_bf, a_bf, b_bf, alpha=alpha, rank=rank)
    )
    ref_bf = w_bf.astype(jnp.float32) + (a_bf @ b_bf).T * scale
    assert out_bf.dtype == jnp.bfloat16
    assert jnp.allclose(out_bf.astype(jnp.float32), ref_bf, atol=3e-2, rtol=3e-2)

    # 'active=False' path returns the weight untouched, like the PyTorch module.
    assert jnp.array_equal(
        lora_forward(original_weight, lora_A, lora_B2, alpha=alpha, rank=rank,
                     active=False),
        original_weight,
    )

    print("KERNEL_OK")
</pallas_src>

<mosaic_0001>
module attributes {stable_mosaic.version = 11 : i64} {
  func.func @_lora_merge_kernel(%arg0: i32, %arg1: i32, %arg2: memref<64x32xf32, #tpu.memory_space<vmem>>, %arg3: memref<64x8xf32, #tpu.memory_space<vmem>>, %arg4: memref<8x32xf32, #tpu.memory_space<vmem>>, %arg5: memref<64x32xf32, #tpu.memory_space<vmem>>) attributes {dimension_semantics = [#tpu.dimension_semantics<parallel>, #tpu.dimension_semantics<parallel>], iteration_bounds = array<i64: 1, 1>, scalar_prefetch = 0 : i64, scratch_operands = 0 : i64, tpu.core_type = #tpu.core_type<tc>, window_params = [{transform_indices = @transform_0, window_bounds = array<i64: 64, 32>}, {pipeline_mode = #tpu.pipeline_mode<synchronous>, transform_indices = @transform_1, window_bounds = array<i64: 64, 8>}, {transform_indices = @transform_2, window_bounds = array<i64: 8, 32>}, {transform_indices = @transform_3, window_bounds = array<i64: 64, 32>}]} {
    %c64_i32 = arith.constant 64 : i32
    %0 = arith.muli %arg0, %c64_i32 : i32
    %1 = tpu.assume_multiple %0, 64 : i32
    %2 = arith.index_cast %1 : i32 to index
    %c0 = arith.constant 0 : index
    %3 = vector.load %arg3[%2, %c0] : memref<64x8xf32, #tpu.memory_space<vmem>>, vector<64x8xf32>
    %c0_0 = arith.constant 0 : index
    %c0_1 = arith.constant 0 : index
    %4 = vector.load %arg4[%c0_0, %c0_1] : memref<8x32xf32, #tpu.memory_space<vmem>>, vector<8x32xf32>
    %cst = arith.constant dense<0.000000e+00> : vector<64x32xf32>
    %5 = tpu.matmul %3, %4, %cst {dimension_numbers = #tpu.dot_dimension_numbers<[1], [0], [0], [1], [0, 0, 1, 1], [], []>} : vector<64x8xf32>, vector<8x32xf32>, vector<64x32xf32> -> vector<64x32xf32>
    %c0_2 = arith.constant 0 : index
    %c0_3 = arith.constant 0 : index
    %6 = vector.load %arg2[%c0_2, %c0_3] : memref<64x32xf32, #tpu.memory_space<vmem>>, vector<64x32xf32>
    %7 = arith.addf %6, %5 : vector<64x32xf32>
    %c0_4 = arith.constant 0 : index
    %c0_5 = arith.constant 0 : index
    %8 = vector.load %arg5[%c0_4, %c0_5] : memref<64x32xf32, #tpu.memory_space<vmem>>, vector<64x32xf32>
    tpu.vector_store %arg5[%c0_4, %c0_5], %7 {strides = array<i32>} : memref<64x32xf32, #tpu.memory_space<vmem>>, vector<64x32xf32>,
    return
  }
  func.func @transform_0(%arg0: i32, %arg1: i32) -> (i32, i32) {
    %c0_i32 = arith.constant 0 : i32
    return %arg0, %arg1 : i32, i32
  }
  func.func @transform_1(%arg0: i32, %arg1: i32) -> (i32, i32) {
    %c0_i32 = arith.constant 0 : i32
    %c0_i32_0 = arith.constant 0 : i32
    %c0_i32_1 = arith.constant 0 : i32
    return %c0_i32, %c0_i32_0 : i32, i32
  }
  func.func @transform_2(%arg0: i32, %arg1: i32) -> (i32, i32) {
    %c0_i32 = arith.constant 0 : i32
    %c0_i32_0 = arith.constant 0 : i32
    return %c0_i32, %arg1 : i32, i32
  }
  func.func @transform_3(%arg0: i32, %arg1: i32) -> (i32, i32) {
    %c0_i32 = arith.constant 0 : i32
    return %arg0, %arg1 : i32, i32
  }
}

</mosaic_0001>

<bundles_post_ra>
// kernel: tpu_custom_call.1
= control target key start
LH: loop header
LB: loop body
LE: loop exit
PB: predicated region body
PF: predicated region fallthrough
CT: control target
= control target key end

     0   :  { %vm25_vm0 = vcmask 64512   ;;  %vm171_vm1 = vcmask 261120   ;;  %s328_s2 = inlined_call_operand.vmem [shape: f32[8,32], index: 2, kind: input, shape index: {}]   ;;  %s329_s1 = inlined_call_operand.vmem [shape: f32[64,8], index: 1, kind: input, shape index: {}]   ;;  %s330_s0 = inlined_call_operand.vmem [shape: f32[64,32], index: 0, kind: input, shape index: {}]   ;;  %s331_s3 = inlined_call_operand.vmem [shape: f32[64,32], index: 3, kind: output, shape index: {}]  }
   0x1   :  { %v24_v0 = vld [vmem:[%s328_s2] sm:$0xff]  ;;  %v17_v3 = vld [vmem:[%s329_s1 + $0x8] sm:$0xff]  ;;  %v18_v5 = vld [vmem:[%s329_s1 + $0x10] sm:$0xff] }
   0x2   :  { %v16_v1 = vld [vmem:[%s329_s1] sm:$0xff]  ;;  %201 = vmatprep.subr.mxu0 %v24_v0  ;;  %215 = vmatprep.subr.mxu1 %v24_v0  ;;  %v21_v4 = vld [vmem:[%s329_s1 + $0x28] sm:$0xff]  ;;  %v22_v6 = vld [vmem:[%s329_s1 + $0x30] sm:$0xff] }
   0x3   :  { %v20_v2 = vld [vmem:[%s329_s1 + $0x20] sm:$0xff]  ;;  %202 = vmatpush3.msra.mxu0 %v24_v0  ;;  %216 = vmatpush3.msra.mxu1 %v24_v0  ;;  %v19_v7 = vld [vmem:[%s329_s1 + $0x18] sm:$0xff]  ;;  %v156_v9 = vld [vmem:[%s330_s0 + $0x8] sm:$0xff] }
   0x4   :  { %203 = vmatprep.mubr.msk.f32.mxu0 %vm25_vm0, %v16_v1  ;;  %209 = vmatprep.mubr.msk.f32.mxu1 %vm25_vm0, %v20_v2  ;;  %v23_v8 = vld [vmem:[%s329_s1 + $0x38] sm:$0xff]  ;;  %v160_v10 = vld [vmem:[%s330_s0 + $0x28] sm:$0xff]  ;;  %v155_v13 = vld [vmem:[%s330_s0] sm:$0xff] }
   0x5   :  { %204 = vmatmul.mubr.msk.f32.vlgmr.msra.gmra.mxu0 %vm25_vm0, %v17_v3  ;;  %210 = vmatmul.mubr.msk.f32.vlgmr.msra.gmra.mxu1 %vm25_vm0, %v21_v4  ;;  %v159_v14 = vld [vmem:[%s330_s0 + $0x20] sm:$0xff]  ;;  %v158_v19 = vld [vmem:[%s330_s0 + $0x18] sm:$0xff]  ;;  %v157_v25 = vld [vmem:[%s330_s0 + $0x10] sm:$0xff] }
   0x6   :  { %206 = vmatprep.mubr.msk.f32.mxu0 %vm25_vm0, %v18_v5  ;;  %212 = vmatprep.mubr.msk.f32.mxu1 %vm25_vm0, %v22_v6  ;;  %v162_v20 = vld [vmem:[%s330_s0 + $0x38] sm:$0xff]  ;;  %v161_v26 = vld [vmem:[%s330_s0 + $0x30] sm:$0xff] }
   0x9   :  { %207 = vmatmul.mubr.msk.f32.gmra.mxu0 %vm25_vm0, %v19_v7  ;;  %213 = vmatmul.mubr.msk.f32.gmra.mxu1 %vm25_vm0, %v23_v8 }
  0xc5   :  { %v205_v11 = vpop.f32.mrf.mxu0  ;;  %v211_v12 = vpop.f32.mrf.mxu1 }
  0xc6   :  { %v164_v15 = vadd.f32 %v205_v11, %v156_v9  ;;  %v168_v16 = vadd.f32 %v211_v12, %v160_v10 }
  0xc7   :  { %v116_v17 = vpop.f32.mrf.mxu0  ;;  %v136_v18 = vpop.f32.mrf.mxu1 }
  0xc8   :  { %173 = vst.msk [vmem:[%s331_s3 + $0x8] sm:$0xff] %vm171_vm1, %v164_v15  ;;  %177 = vst.msk [vmem:[%s331_s3 + $0x28] sm:$0xff] %vm171_vm1, %v168_v16  ;;  %v163_v21 = vadd.f32 %v155_v13, %v116_v17  ;;  %v167_v22 = vadd.f32 %v159_v14, %v136_v18 }
  0xc9   :  { %v208_v23 = vpop.f32.mrf.mxu0  ;;  %v214_v24 = vpop.f32.mrf.mxu1 }
  0xca   :  { %172 = vst.msk [vmem:[%s331_s3] sm:$0xff] %vm171_vm1, %v163_v21  ;;  %176 = vst.msk [vmem:[%s331_s3 + $0x20] sm:$0xff] %vm171_vm1, %v167_v22  ;;  %v166_v27 = vadd.f32 %v208_v23, %v158_v19  ;;  %v170_v28 = vadd.f32 %v214_v24, %v162_v20 }
  0xcb   :  { %v126_v29 = vpop.f32.mrf.mxu0  ;;  %v146_v30 = vpop.f32.mrf.mxu1 }
  0xcc   :  { %175 = vst.msk [vmem:[%s331_s3 + $0x18] sm:$0xff] %vm171_vm1, %v166_v27  ;;  %179 = vst.msk [vmem:[%s331_s3 + $0x38] sm:$0xff] %vm171_vm1, %v170_v28  ;;  %v165_v31 = vadd.f32 %v157_v25, %v126_v29  ;;  %v169_v32 = vadd.f32 %v161_v26, %v146_v30 }
  0xce   :  { %174 = vst.msk [vmem:[%s331_s3 + $0x10] sm:$0xff] %vm171_vm1, %v165_v31  ;;  %178 = vst.msk [vmem:[%s331_s3 + $0x30] sm:$0xff] %vm171_vm1, %v169_v32 }

</bundles_post_ra>
